<compile_context>
chip_gen: v7x
topology: tpu7x:2x2x1
jax: 0.10.0
libtpu: 0.0.40
codegen_flags: <defaults>
</compile_context>

<pallas_src>
import functools

import jax
import jax.numpy as jnp
from jax.experimental import pallas as pl
from jax.experimental.pallas import tpu as pltpu


def _llama_block_kernel(n_heads, head_dim, causal, eps, bb, S, H,
                        x_ref, scale_ref, wqkv_ref, wo_ref,
                        w1_ref, b1_ref, wgl_ref, bgl_ref, beta_ref,
                        cos_ref, sin_ref, o_ref):
    f32 = jnp.float32
    bf16 = lambda t: t.astype(jnp.bfloat16)
    M = bb * S                                      # batch folded into GEMM M rows

    x = x_ref[...].reshape(M, H).astype(f32)        # (bb,S,H)->(M,H): free leading merge
    scale = scale_ref[...].astype(f32)              # (1, H)

    def rmsnorm(v):                                 # per-token RMS over hidden dim, f32
        ms = jnp.mean(v * v, axis=-1, keepdims=True)
        return v * jax.lax.rsqrt(ms + eps) * scale

    # ---- pre-attention RMSNorm ----
    x1 = rmsnorm(x)
    x1b = bf16(x1)

    # ---- one wide projection GEMM: columns = [Wq | Wk | Wv | Wq@P | Wk@P] ----
    # P is the exact signed rotate-half permutation, folded into the weights on the
    # host, so RoPE needs no extra matmul / roll / per-head slicing in-kernel.
    proj = jnp.dot(x1b, wqkv_ref[...], preferred_element_type=f32)   # (M, 5H) f32
    q = proj[:, 0 * H:1 * H]
    k = proj[:, 1 * H:2 * H]
    v = proj[:, 2 * H:3 * H]
    q_rot = proj[:, 3 * H:4 * H]                    # == rotate_half(q), bit-exact
    k_rot = proj[:, 4 * H:5 * H]                    # == rotate_half(k), bit-exact

    cos = cos_ref[...]                              # (M, H) f32, lane-dense tables
    sin = sin_ref[...]
    q = q * cos + q_rot * sin
    k = k * cos + k_rot * sin

    # ---- multi-head attention (scores/softmax in f32) ----
    inv_sqrt_d = 1.0 / (head_dim ** 0.5)
    if causal:                                      # additive bias, hoisted out of the head loop
        row = jax.lax.broadcasted_iota(jnp.int32, (S, S), 0)
        col = jax.lax.broadcasted_iota(jnp.int32, (S, S), 1)
        bias = jnp.where(col <= row, 0.0, -1e30).astype(f32)
    else:
        bias = jnp.zeros((S, S), f32)

    qb, kb, vb = bf16(q), bf16(k), bf16(v)
    ctx_heads = []
    # Static unroll is fine for small fixed n_heads; see TODO above for large counts.
    for h in range(n_heads):
        lo, hi = h * head_dim, (h + 1) * head_dim
        qh = qb[:, lo:hi].reshape(bb, S, head_dim)  # per-sequence attention
        kh = kb[:, lo:hi].reshape(bb, S, head_dim)
        vh = vb[:, lo:hi].reshape(bb, S, head_dim)
        s = jnp.einsum("bqd,bkd->bqk", qh, kh, preferred_element_type=f32)
        s = s * inv_sqrt_d + bias[None]
        m = jnp.max(s, axis=-1, keepdims=True)
        p = jnp.exp(s - m)
        p = p * pl.reciprocal(jnp.sum(p, axis=-1, keepdims=True), approx=True)
        ctx_heads.append(jnp.einsum("bqk,bkd->bqd", bf16(p), vh,
                                    preferred_element_type=f32))
    # assemble (M, H) context, then ONE K=H output-projection GEMM
    ctx = jnp.concatenate(ctx_heads, axis=-1).reshape(M, H)
    attn = jnp.dot(bf16(ctx), wo_ref[...], preferred_element_type=f32)

    x2 = x1 + attn                                  # residual off normalized value (matches module)

    # ---- pre-FFN RMSNorm ----
    x3 = rmsnorm(x2)

    # ---- Linear + SwiGLU (gate/linear weights fused into one (H, 2H) GEMM) ----
    h1 = jnp.dot(bf16(x3), w1_ref[...], preferred_element_type=f32) + b1_ref[...]
    gl = jnp.dot(bf16(h1), wgl_ref[...], preferred_element_type=f32) + bgl_ref[...]
    g, lin = gl[:, :H], gl[:, H:]
    beta = beta_ref[...].astype(f32)                # (1, 1), broadcasts
    ffn = (g * jax.nn.sigmoid(beta * g)) * lin

    o_ref[...] = (x3 + ffn).reshape(bb, S, H).astype(o_ref.dtype)


def _rope_tables_full(S, H, head_dim, dtype=jnp.float32):
    """cos/sin tables pre-tiled to (S, H) so in-kernel RoPE is lane-dense."""
    half = head_dim // 2
    inv_freq = 1.0 / (10000.0 ** (jnp.arange(half, dtype=jnp.float32) / half))
    pos = jnp.arange(S, dtype=jnp.float32)
    angles = pos[:, None] * inv_freq[None, :]               # (S, half)
    angles = jnp.concatenate([angles, angles], axis=-1)     # (S, head_dim)
    angles = jnp.tile(angles, (1, H // head_dim))            # (S, H)
    return jnp.cos(angles).astype(dtype), jnp.sin(angles).astype(dtype)


def _rotate_half_matrix(H, head_dim, dtype=jnp.float32):
    """(H, H) exact +/-1 permutation P such that (t @ P) == rotate_half(t) per head."""
    half = head_dim // 2
    eye = jnp.eye(half, dtype=dtype)
    zeros = jnp.zeros((half, half), dtype=dtype)
    r = jnp.concatenate(
        [jnp.concatenate([zeros, eye], axis=1),
         jnp.concatenate([-eye, zeros], axis=1)], axis=0)    # (head_dim, head_dim)
    n_heads = H // head_dim
    return jnp.kron(jnp.eye(n_heads, dtype=dtype), r)        # block-diagonal (H, H)


def _pick_batch_block(B, S):
    """Fold batches into GEMM M rows (target ~256) but keep >=2 grid steps when B>=2."""
    rows_target = 256
    bb = max(1, min(B, rows_target // max(S, 1)))
    if B >= 2:
        bb = min(bb, max(1, B // 2))     # leave at least a 2-way parallel axis (v7x: 2 TCs)
    while B % bb:                        # bb must divide B
        bb -= 1
    return bb


def llama_block(x, params, *, n_heads, causal=True, eps=1e-8):
    B, S, H = x.shape
    assert H % n_heads == 0
    head_dim = H // n_heads
    bb = _pick_batch_block(B, S)
    grid_b = B // bb

    bf = lambda t: t.astype(jnp.bfloat16)

    # RoPE rotate-half folded into the fused projection weight (exact signed permutation).
    P = _rotate_half_matrix(H, head_dim)
    wqkv = bf(jnp.concatenate(
        [params["wq"], params["wk"], params["wv"],
         params["wq"] @ P, params["wk"] @ P], axis=1))        # (H, 5H) bf16
    wo = bf(params["wo"])                                     # (H, H)
    w1 = bf(params["w1"])                                     # (H, H)
    wgl = bf(jnp.concatenate([params["wg"], params["wl"]], axis=1))   # (H, 2H)
    bgl = jnp.concatenate([params["bg"], params["bl"]], axis=1)       # (1, 2H)

    cos, sin = _rope_tables_full(S, H, head_dim, jnp.float32)
    cos_m = jnp.tile(cos, (bb, 1))                            # (bb*S, H), block-invariant
    sin_m = jnp.tile(sin, (bb, 1))

    kernel = functools.partial(_llama_block_kernel, n_heads, head_dim, causal, eps, bb, S, H)
    operands = (x, params["rms_scale"], wqkv, wo, w1, params["b1"],
                wgl, bgl, params["beta"], cos_m, sin_m)

    # rough resident working set -> scoped VMEM limit (cap at 48 MiB: headroom on v7x's 64 MiB)
    weight_bytes = (5 * H * H + H * H + H * H + 2 * H * H) * 2
    table_bytes = (2 * bb * S * H + 7 * H + 2) * 4
    act_bytes = 2 * (bb * S * H) * 4
    vmem_limit = int(min(max(6 * (weight_bytes + table_bytes + act_bytes),
                             32 * 1024 * 1024), 48 * 1024 * 1024))

    cost = pl.CostEstimate(
        flops=int(18 * B * S * H * H + 4 * B * S * S * H),
        transcendentals=int(B * (n_heads * S * S + S * H + 2 * S)),
        bytes_accessed=int(2 * B * S * H * x.dtype.itemsize + weight_bytes + table_bytes),
    )

    const2d = lambda shape: pl.BlockSpec(shape, lambda b: (0, 0))
    in_specs = [
        pl.BlockSpec((bb, S, H), lambda b: (b, 0, 0)),        # x (batch chunk folded into M)
        const2d((1, H)),                                      # rms scale
        const2d((H, 5 * H)),                                  # fused [Wq|Wk|Wv|WqP|WkP]
        const2d((H, H)),                                      # Wo
        const2d((H, H)), const2d((1, H)),                     # W1, b1
        const2d((H, 2 * H)), const2d((1, 2 * H)),             # fused [Wg|Wl], [bg|bl]
        const2d((1, 1)),                                      # beta
        const2d((bb * S, H)), const2d((bb * S, H)),           # cos, sin (lane-dense)
    ]
    grid_spec = pltpu.PrefetchScalarGridSpec(
        num_scalar_prefetch=0,
        grid=(grid_b,),
        in_specs=in_specs,
        out_specs=pl.BlockSpec((bb, S, H), lambda b: (b, 0, 0)),
    )
    out = pl.pallas_call(
        kernel,
        out_shape=jax.ShapeDtypeStruct((B, S, H), x.dtype),
        grid_spec=grid_spec,
        compiler_params=pltpu.CompilerParams(
            dimension_semantics=("parallel",),
            vmem_limit_bytes=vmem_limit),
        cost_estimate=cost,
    )(*operands)
    return out


# ---------------- pure-JAX reference (mirrors the kernel's bf16-in/f32-acc matmuls) --------
def llama_block_ref(x, params, *, n_heads, causal=True, eps=1e-8):
    B, S, H = x.shape
    head_dim = H // n_heads
    cos, sin = _rope_tables_full(S, H, head_dim)
    scale = params["rms_scale"]
    bf = lambda t: t.astype(jnp.bfloat16)

    def rmsnorm(v):
        return v * jax.lax.rsqrt(jnp.mean(v * v, axis=-1, keepdims=True) + eps) * scale

    def mm(a, w):
        return jnp.einsum("...i,ij->...j", bf(a), bf(w), preferred_element_type=jnp.float32)

    x1 = rmsnorm(x)
    q, k, v = mm(x1, params["wq"]), mm(x1, params["wk"]), mm(x1, params["wv"])

    def rope(t):
        half = head_dim // 2
        t4 = t.reshape(B, S, n_heads, head_dim)
        t_rot = jnp.concatenate([-t4[..., half:], t4[..., :half]], axis=-1).reshape(B, S, H)
        return t * cos + t_rot * sin

    q, k = rope(q), rope(k)

    def split(t):
        return t.reshape(B, S, n_heads, head_dim).transpose(0, 2, 1, 3)

    qh, kh, vh = split(q), split(k), split(v)
    s = jnp.einsum("bhqd,bhkd->bhqk", bf(qh), bf(kh),
                   preferred_element_type=jnp.float32) / (head_dim ** 0.5)
    if causal:
        row = jnp.arange(S)[:, None]
        col = jnp.arange(S)[None, :]
        s = jnp.where(col <= row, s, -1e30)
    p = jax.nn.softmax(s, axis=-1)
    o = jnp.einsum("bhqk,bhkd->bhqd", bf(p), bf(vh), preferred_element_type=jnp.float32)
    o = o.transpose(0, 2, 1, 3).reshape(B, S, H)
    attn = mm(o, params["wo"])

    x2 = x1 + attn
    x3 = rmsnorm(x2)
    h1 = mm(x3, params["w1"]) + params["b1"]
    g = mm(h1, params["wg"]) + params["bg"]
    lin = mm(h1, params["wl"]) + params["bl"]
    ffn = (g * jax.nn.sigmoid(params["beta"] * g)) * lin
    return x3 + ffn


def init_params(key, H):
    ks = jax.random.split(key, 7)
    s = 0.05
    return {
        "rms_scale": jnp.ones((1, H), jnp.float32),
        "wq": jax.random.normal(ks[0], (H, H), jnp.float32) * s,
        "wk": jax.random.normal(ks[1], (H, H), jnp.float32) * s,
        "wv": jax.random.normal(ks[2], (H, H), jnp.float32) * s,
        "wo": jax.random.normal(ks[3], (H, H), jnp.float32) * s,
        "w1": jax.random.normal(ks[4], (H, H), jnp.float32) * s,
        "b1": jnp.zeros((1, H), jnp.float32),
        "wg": jax.random.normal(ks[5], (H, H), jnp.float32) * s,
        "bg": jnp.zeros((1, H), jnp.float32),
        "wl": jax.random.normal(ks[6], (H, H), jnp.float32) * s,
        "bl": jnp.zeros((1, H), jnp.float32),
        "beta": jnp.ones((1, 1), jnp.float32),   # deterministic stand-in for torch.randn(1)
    }


if __name__ == "__main__":
    B, S, H, n_heads = 2, 8, 32, 4               # hidden_size=32, max_seq_len=8, n_heads=4, causal
    key = jax.random.PRNGKey(0)
    kx, kp = jax.random.split(key)
    x = jax.random.normal(kx, (B, S, H), jnp.float32)
    params = init_params(kp, H)

    out = jax.block_until_ready(llama_block(x, params, n_heads=n_heads, causal=True))
    ref = llama_block_ref(x, params, n_heads=n_heads, causal=True)

    assert out.shape == (B, S, H)
    assert bool(jnp.all(jnp.isfinite(out)))
    err = float(jnp.max(jnp.abs(out - ref)))
    assert err < 2e-2, f"max abs err {err}"
    print("KERNEL_OK")
</pallas_src>

<mosaic_0001>
module attributes {stable_mosaic.version = 11 : i64} {
  func.func @_llama_block_kernel(%arg0: i32, %arg1: memref<1x8x32xf32, #tpu.memory_space<vmem>>, %arg2: memref<1x32xf32, #tpu.memory_space<vmem>>, %arg3: memref<32x160xbf16, #tpu.memory_space<vmem>>, %arg4: memref<32x32xbf16, #tpu.memory_space<vmem>>, %arg5: memref<32x32xbf16, #tpu.memory_space<vmem>>, %arg6: memref<1x32xf32, #tpu.memory_space<vmem>>, %arg7: memref<32x64xbf16, #tpu.memory_space<vmem>>, %arg8: memref<1x64xf32, #tpu.memory_space<vmem>>, %arg9: memref<1x1xf32, #tpu.memory_space<vmem>>, %arg10: memref<8x32xf32, #tpu.memory_space<vmem>>, %arg11: memref<8x32xf32, #tpu.memory_space<vmem>>, %arg12: memref<1x8x32xf32, #tpu.memory_space<vmem>>) attributes {dimension_semantics = [#tpu.dimension_semantics<parallel>], iteration_bounds = array<i64: 2>, scalar_prefetch = 0 : i64, scratch_operands = 0 : i64, tpu.core_type = #tpu.core_type<tc>, window_params = [{transform_indices = @transform_0, window_bounds = array<i64: 1, 8, 32>}, {pipeline_mode = #tpu.pipeline_mode<synchronous>, transform_indices = @transform_1, window_bounds = array<i64: 1, 32>}, {pipeline_mode = #tpu.pipeline_mode<synchronous>, transform_indices = @transform_2, window_bounds = array<i64: 32, 160>}, {pipeline_mode = #tpu.pipeline_mode<synchronous>, transform_indices = @transform_3, window_bounds = array<i64: 32, 32>}, {pipeline_mode = #tpu.pipeline_mode<synchronous>, transform_indices = @transform_4, window_bounds = array<i64: 32, 32>}, {pipeline_mode = #tpu.pipeline_mode<synchronous>, transform_indices = @transform_5, window_bounds = array<i64: 1, 32>}, {pipeline_mode = #tpu.pipeline_mode<synchronous>, transform_indices = @transform_6, window_bounds = array<i64: 32, 64>}, {pipeline_mode = #tpu.pipeline_mode<synchronous>, transform_indices = @transform_7, window_bounds = array<i64: 1, 64>}, {pipeline_mode = #tpu.pipeline_mode<synchronous>, transform_indices = @transform_8, window_bounds = array<i64: 1, 1>}, {pipeline_mode = #tpu.pipeline_mode<synchronous>, transform_indices = @transform_9, window_bounds = array<i64: 8, 32>}, {pipeline_mode = #tpu.pipeline_mode<synchronous>, transform_indices = @transform_10, window_bounds = array<i64: 8, 32>}, {transform_indices = @transform_11, window_bounds = array<i64: 1, 8, 32>}]} {
    %c0 = arith.constant 0 : index
    %c0_0 = arith.constant 0 : index
    %c0_1 = arith.constant 0 : index
    %0 = vector.load %arg1[%c0, %c0_0, %c0_1] : memref<1x8x32xf32, #tpu.memory_space<vmem>>, vector<1x8x32xf32>
    %1 = vector.shape_cast %0 : vector<1x8x32xf32> to vector<8x32xf32>
    %c0_2 = arith.constant 0 : index
    %c0_3 = arith.constant 0 : index
    %2 = vector.load %arg2[%c0_2, %c0_3] : memref<1x32xf32, #tpu.memory_space<vmem>>, vector<1x32xf32>
    %3 = arith.mulf %1, %1 : vector<8x32xf32>
    %cst = arith.constant dense<0.000000e+00> : vector<8xf32>
    %4 = vector.multi_reduction <add>, %3, %cst [1] : vector<8x32xf32> to vector<8xf32>
    %5 = vector.shape_cast %4 : vector<8xf32> to vector<8x1xf32>
    %cst_4 = arith.constant 3.200000e+01 : f32
    %6 = vector.broadcast %cst_4 : f32 to vector<8x1xf32>
    %7 = arith.divf %5, %6 : vector<8x1xf32>
    %cst_5 = arith.constant 9.99999993E-9 : f32
    %8 = vector.broadcast %cst_5 : f32 to vector<8x1xf32>
    %9 = arith.addf %7, %8 : vector<8x1xf32>
    %10 = math.rsqrt %9 : vector<8x1xf32>
    %11 = vector.broadcast %10 : vector<8x1xf32> to vector<8x32xf32>
    %12 = arith.mulf %1, %11 : vector<8x32xf32>
    %13 = vector.broadcast %2 : vector<1x32xf32> to vector<8x32xf32>
    %14 = arith.mulf %12, %13 : vector<8x32xf32>
    %15 = arith.truncf %14 : vector<8x32xf32> to vector<8x32xbf16>
    %c0_6 = arith.constant 0 : index
    %c0_7 = arith.constant 0 : index
    %16 = vector.load %arg3[%c0_6, %c0_7] : memref<32x160xbf16, #tpu.memory_space<vmem>>, vector<32x160xbf16>
    %cst_8 = arith.constant dense<0.000000e+00> : vector<8x160xf32>
    %17 = tpu.matmul %15, %16, %cst_8 {dimension_numbers = #tpu.dot_dimension_numbers<[1], [0], [0], [1], [0, 0, 1, 1], [], []>} : vector<8x32xbf16>, vector<32x160xbf16>, vector<8x160xf32> -> vector<8x160xf32>
    %18 = vector.extract_strided_slice %17 {offsets = [0, 0], sizes = [8, 32], strides = [1, 1]} : vector<8x160xf32> to vector<8x32xf32>
    %19 = vector.extract_strided_slice %17 {offsets = [0, 32], sizes = [8, 32], strides = [1, 1]} : vector<8x160xf32> to vector<8x32xf32>
    %20 = vector.extract_strided_slice %17 {offsets = [0, 64], sizes = [8, 32], strides = [1, 1]} : vector<8x160xf32> to vector<8x32xf32>
    %21 = vector.extract_strided_slice %17 {offsets = [0, 96], sizes = [8, 32], strides = [1, 1]} : vector<8x160xf32> to vector<8x32xf32>
    %22 = vector.extract_strided_slice %17 {offsets = [0, 128], sizes = [8, 32], strides = [1, 1]} : vector<8x160xf32> to vector<8x32xf32>
    %c0_9 = arith.constant 0 : index
    %c0_10 = arith.constant 0 : index
    %23 = vector.load %arg10[%c0_9, %c0_10] : memref<8x32xf32, #tpu.memory_space<vmem>>, vector<8x32xf32>
    %c0_11 = arith.constant 0 : index
    %c0_12 = arith.constant 0 : index
    %24 = vector.load %arg11[%c0_11, %c0_12] : memref<8x32xf32, #tpu.memory_space<vmem>>, vector<8x32xf32>
    %25 = arith.mulf %18, %23 : vector<8x32xf32>
    %26 = arith.mulf %21, %24 : vector<8x32xf32>
    %27 = arith.addf %25, %26 : vector<8x32xf32>
    %28 = arith.mulf %19, %23 : vector<8x32xf32>
    %29 = arith.mulf %22, %24 : vector<8x32xf32>
    %30 = arith.addf %28, %29 : vector<8x32xf32>
    %31 = tpu.iota {dimensions = array<i32: 0>} : vector<8x8xi32>
    %32 = tpu.iota {dimensions = array<i32: 1>} : vector<8x8xi32>
    %33 = arith.cmpi sle, %32, %31 : vector<8x8xi32>
    %cst_13 = arith.constant 0.000000e+00 : f32
    %cst_14 = arith.constant -1.000000e+30 : f32
    %34 = vector.broadcast %cst_13 : f32 to vector<8x8xf32>
    %35 = vector.broadcast %cst_14 : f32 to vector<8x8xf32>
    %36 = arith.select %33, %34, %35 : vector<8x8xi1>, vector<8x8xf32>
    %37 = arith.truncf %27 : vector<8x32xf32> to vector<8x32xbf16>
    %38 = arith.truncf %30 : vector<8x32xf32> to vector<8x32xbf16>
    %39 = arith.truncf %20 : vector<8x32xf32> to vector<8x32xbf16>
    %40 = vector.extract_strided_slice %37 {offsets = [0, 0], sizes = [8, 8], strides = [1, 1]} : vector<8x32xbf16> to vector<8x8xbf16>
    %41 = vector.shape_cast %40 : vector<8x8xbf16> to vector<1x8x8xbf16>
    %42 = vector.extract_strided_slice %38 {offsets = [0, 0], sizes = [8, 8], strides = [1, 1]} : vector<8x32xbf16> to vector<8x8xbf16>
    %43 = vector.shape_cast %42 : vector<8x8xbf16> to vector<1x8x8xbf16>
    %44 = vector.extract_strided_slice %39 {offsets = [0, 0], sizes = [8, 8], strides = [1, 1]} : vector<8x32xbf16> to vector<8x8xbf16>
    %45 = vector.shape_cast %44 : vector<8x8xbf16> to vector<1x8x8xbf16>
    "tpu.trace_start"() <{level = 10 : i32, message = "bqd,bkd->bqk"}> : () -> ()
    %cst_15 = arith.constant dense<0.000000e+00> : vector<1x8x8xf32>
    %46 = tpu.matmul %41, %43, %cst_15 {dimension_numbers = #tpu.dot_dimension_numbers<[2], [2], [1], [1], [0, 0, 0, 1, 1, 1], [0], [0]>} : vector<1x8x8xbf16>, vector<1x8x8xbf16>, vector<1x8x8xf32> -> vector<1x8x8xf32>
    "tpu.trace_stop"() : () -> ()
    %cst_16 = arith.constant 0.353553385 : f32
    %47 = vector.broadcast %cst_16 : f32 to vector<1x8x8xf32>
    %48 = arith.mulf %46, %47 : vector<1x8x8xf32>
    %49 = vector.shape_cast %36 : vector<8x8xf32> to vector<1x8x8xf32>
    %50 = arith.addf %48, %49 : vector<1x8x8xf32>
    %cst_17 = arith.constant dense<0xFF800000> : vector<1x8xf32>
    %51 = vector.multi_reduction <maximumf>, %50, %cst_17 [2] : vector<1x8x8xf32> to vector<1x8xf32>
    %52 = vector.shape_cast %51 : vector<1x8xf32> to vector<1x8x1xf32>
    %53 = vector.broadcast %52 : vector<1x8x1xf32> to vector<1x8x8xf32>
    %54 = arith.subf %50, %53 : vector<1x8x8xf32>
    %55 = math.exp %54 : vector<1x8x8xf32>
    %cst_18 = arith.constant dense<0.000000e+00> : vector<1x8xf32>
    %56 = vector.multi_reduction <add>, %55, %cst_18 [2] : vector<1x8x8xf32> to vector<1x8xf32>
    %57 = vector.shape_cast %56 : vector<1x8xf32> to vector<1x8x1xf32>
    %58 = tpu.reciprocal %57 {approx = true} : vector<1x8x1xf32> -> vector<1x8x1xf32>
    %59 = vector.broadcast %58 : vector<1x8x1xf32> to vector<1x8x8xf32>
    %60 = arith.mulf %55, %59 : vector<1x8x8xf32>
    %61 = arith.truncf %60 : vector<1x8x8xf32> to vector<1x8x8xbf16>
    "tpu.trace_start"() <{level = 10 : i32, message = "bqk,bkd->bqd"}> : () -> ()
    %cst_19 = arith.constant dense<0.000000e+00> : vector<1x8x8xf32>
    %62 = tpu.matmul %61, %45, %cst_19 {dimension_numbers = #tpu.dot_dimension_numbers<[2], [1], [1], [2], [0, 0, 0, 1, 1, 2], [0], [0]>} : vector<1x8x8xbf16>, vector<1x8x8xbf16>, vector<1x8x8xf32> -> vector<1x8x8xf32>
    "tpu.trace_stop"() : () -> ()
    %63 = vector.extract_strided_slice %37 {offsets = [0, 8], sizes = [8, 8], strides = [1, 1]} : vector<8x32xbf16> to vector<8x8xbf16>
    %64 = vector.shape_cast %63 : vector<8x8xbf16> to vector<1x8x8xbf16>
    %65 = vector.extract_strided_slice %38 {offsets = [0, 8], sizes = [8, 8], strides = [1, 1]} : vector<8x32xbf16> to vector<8x8xbf16>
    %66 = vector.shape_cast %65 : vector<8x8xbf16> to vector<1x8x8xbf16>
    %67 = vector.extract_strided_slice %39 {offsets = [0, 8], sizes = [8, 8], strides = [1, 1]} : vector<8x32xbf16> to vector<8x8xbf16>
    %68 = vector.shape_cast %67 : vector<8x8xbf16> to vector<1x8x8xbf16>
    "tpu.trace_start"() <{level = 10 : i32, message = "bqd,bkd->bqk"}> : () -> ()
    %cst_20 = arith.constant dense<0.000000e+00> : vector<1x8x8xf32>
    %69 = tpu.matmul %64, %66, %cst_20 {dimension_numbers = #tpu.dot_dimension_numbers<[2], [2], [1], [1], [0, 0, 0, 1, 1, 1], [0], [0]>} : vector<1x8x8xbf16>, vector<1x8x8xbf16>, vector<1x8x8xf32> -> vector<1x8x8xf32>
    "tpu.trace_stop"() : () -> ()
    %cst_21 = arith.constant 0.353553385 : f32
    %70 = vector.broadcast %cst_21 : f32 to vector<1x8x8xf32>
    %71 = arith.mulf %69, %70 : vector<1x8x8xf32>
    %72 = vector.shape_cast %36 : vector<8x8xf32> to vector<1x8x8xf32>
    %73 = arith.addf %71, %72 : vector<1x8x8xf32>
    %cst_22 = arith.constant dense<0xFF800000> : vector<1x8xf32>
    %74 = vector.multi_reduction <maximumf>, %73, %cst_22 [2] : vector<1x8x8xf32> to vector<1x8xf32>
    %75 = vector.shape_cast %74 : vector<1x8xf32> to vector<1x8x1xf32>
    %76 = vector.broadcast %75 : vector<1x8x1xf32> to vector<1x8x8xf32>
    %77 = arith.subf %73, %76 : vector<1x8x8xf32>
    %78 = math.exp %77 : vector<1x8x8xf32>
    %cst_23 = arith.constant dense<0.000000e+00> : vector<1x8xf32>
    %79 = vector.multi_reduction <add>, %78, %cst_23 [2] : vector<1x8x8xf32> to vector<1x8xf32>
    %80 = vector.shape_cast %79 : vector<1x8xf32> to vector<1x8x1xf32>
    %81 = tpu.reciprocal %80 {approx = true} : vector<1x8x1xf32> -> vector<1x8x1xf32>
    %82 = vector.broadcast %81 : vector<1x8x1xf32> to vector<1x8x8xf32>
    %83 = arith.mulf %78, %82 : vector<1x8x8xf32>
    %84 = arith.truncf %83 : vector<1x8x8xf32> to vector<1x8x8xbf16>
    "tpu.trace_start"() <{level = 10 : i32, message = "bqk,bkd->bqd"}> : () -> ()
    %cst_24 = arith.constant dense<0.000000e+00> : vector<1x8x8xf32>
    %85 = tpu.matmul %84, %68, %cst_24 {dimension_numbers = #tpu.dot_dimension_numbers<[2], [1], [1], [2], [0, 0, 0, 1, 1, 2], [0], [0]>} : vector<1x8x8xbf16>, vector<1x8x8xbf16>, vector<1x8x8xf32> -> vector<1x8x8xf32>
    "tpu.trace_stop"() : () -> ()
    %86 = vector.extract_strided_slice %37 {offsets = [0, 16], sizes = [8, 8], strides = [1, 1]} : vector<8x32xbf16> to vector<8x8xbf16>
    %87 = vector.shape_cast %86 : vector<8x8xbf16> to vector<1x8x8xbf16>
    %88 = vector.extract_strided_slice %38 {offsets = [0, 16], sizes = [8, 8], strides = [1, 1]} : vector<8x32xbf16> to vector<8x8xbf16>
    %89 = vector.shape_cast %88 : vector<8x8xbf16> to vector<1x8x8xbf16>
    %90 = vector.extract_strided_slice %39 {offsets = [0, 16], sizes = [8, 8], strides = [1, 1]} : vector<8x32xbf16> to vector<8x8xbf16>
    %91 = vector.shape_cast %90 : vector<8x8xbf16> to vector<1x8x8xbf16>
    "tpu.trace_start"() <{level = 10 : i32, message = "bqd,bkd->bqk"}> : () -> ()
    %cst_25 = arith.constant dense<0.000000e+00> : vector<1x8x8xf32>
    %92 = tpu.matmul %87, %89, %cst_25 {dimension_numbers = #tpu.dot_dimension_numbers<[2], [2], [1], [1], [0, 0, 0, 1, 1, 1], [0], [0]>} : vector<1x8x8xbf16>, vector<1x8x8xbf16>, vector<1x8x8xf32> -> vector<1x8x8xf32>
    "tpu.trace_stop"() : () -> ()
    %cst_26 = arith.constant 0.353553385 : f32
    %93 = vector.broadcast %cst_26 : f32 to vector<1x8x8xf32>
    %94 = arith.mulf %92, %93 : vector<1x8x8xf32>
    %95 = vector.shape_cast %36 : vector<8x8xf32> to vector<1x8x8xf32>
    %96 = arith.addf %94, %95 : vector<1x8x8xf32>
    %cst_27 = arith.constant dense<0xFF800000> : vector<1x8xf32>
    %97 = vector.multi_reduction <maximumf>, %96, %cst_27 [2] : vector<1x8x8xf32> to vector<1x8xf32>
    %98 = vector.shape_cast %97 : vector<1x8xf32> to vector<1x8x1xf32>
    %99 = vector.broadcast %98 : vector<1x8x1xf32> to vector<1x8x8xf32>
    %100 = arith.subf %96, %99 : vector<1x8x8xf32>
    %101 = math.exp %100 : vector<1x8x8xf32>
    %cst_28 = arith.constant dense<0.000000e+00> : vector<1x8xf32>
    %102 = vector.multi_reduction <add>, %101, %cst_28 [2] : vector<1x8x8xf32> to vector<1x8xf32>
    %103 = vector.shape_cast %102 : vector<1x8xf32> to vector<1x8x1xf32>
    %104 = tpu.reciprocal %103 {approx = true} : vector<1x8x1xf32> -> vector<1x8x1xf32>
    %105 = vector.broadcast %104 : vector<1x8x1xf32> to vector<1x8x8xf32>
    %106 = arith.mulf %101, %105 : vector<1x8x8xf32>
    %107 = arith.truncf %106 : vector<1x8x8xf32> to vector<1x8x8xbf16>
    "tpu.trace_start"() <{level = 10 : i32, message = "bqk,bkd->bqd"}> : () -> ()
    %cst_29 = arith.constant dense<0.000000e+00> : vector<1x8x8xf32>
    %108 = tpu.matmul %107, %91, %cst_29 {dimension_numbers = #tpu.dot_dimension_numbers<[2], [1], [1], [2], [0, 0, 0, 1, 1, 2], [0], [0]>} : vector<1x8x8xbf16>, vector<1x8x8xbf16>, vector<1x8x8xf32> -> vector<1x8x8xf32>
    "tpu.trace_stop"() : () -> ()
    %109 = vector.extract_strided_slice %37 {offsets = [0, 24], sizes = [8, 8], strides = [1, 1]} : vector<8x32xbf16> to vector<8x8xbf16>
    %110 = vector.shape_cast %109 : vector<8x8xbf16> to vector<1x8x8xbf16>
    %111 = vector.extract_strided_slice %38 {offsets = [0, 24], sizes = [8, 8], strides = [1, 1]} : vector<8x32xbf16> to vector<8x8xbf16>
    %112 = vector.shape_cast %111 : vector<8x8xbf16> to vector<1x8x8xbf16>
    %113 = vector.extract_strided_slice %39 {offsets = [0, 24], sizes = [8, 8], strides = [1, 1]} : vector<8x32xbf16> to vector<8x8xbf16>
    %114 = vector.shape_cast %113 : vector<8x8xbf16> to vector<1x8x8xbf16>
    "tpu.trace_start"() <{level = 10 : i32, message = "bqd,bkd->bqk"}> : () -> ()
    %cst_30 = arith.constant dense<0.000000e+00> : vector<1x8x8xf32>
    %115 = tpu.matmul %110, %112, %cst_30 {dimension_numbers = #tpu.dot_dimension_numbers<[2], [2], [1], [1], [0, 0, 0, 1, 1, 1], [0], [0]>} : vector<1x8x8xbf16>, vector<1x8x8xbf16>, vector<1x8x8xf32> -> vector<1x8x8xf32>
    "tpu.trace_stop"() : () -> ()
    %cst_31 = arith.constant 0.353553385 : f32
    %116 = vector.broadcast %cst_31 : f32 to vector<1x8x8xf32>
    %117 = arith.mulf %115, %116 : vector<1x8x8xf32>
    %118 = vector.shape_cast %36 : vector<8x8xf32> to vector<1x8x8xf32>
    %119 = arith.addf %117, %118 : vector<1x8x8xf32>
    %cst_32 = arith.constant dense<0xFF800000> : vector<1x8xf32>
    %120 = vector.multi_reduction <maximumf>, %119, %cst_32 [2] : vector<1x8x8xf32> to vector<1x8xf32>
    %121 = vector.shape_cast %120 : vector<1x8xf32> to vector<1x8x1xf32>
    %122 = vector.broadcast %121 : vector<1x8x1xf32> to vector<1x8x8xf32>
    %123 = arith.subf %119, %122 : vector<1x8x8xf32>
    %124 = math.exp %123 : vector<1x8x8xf32>
    %cst_33 = arith.constant dense<0.000000e+00> : vector<1x8xf32>
    %125 = vector.multi_reduction <add>, %124, %cst_33 [2] : vector<1x8x8xf32> to vector<1x8xf32>
    %126 = vector.shape_cast %125 : vector<1x8xf32> to vector<1x8x1xf32>
    %127 = tpu.reciprocal %126 {approx = true} : vector<1x8x1xf32> -> vector<1x8x1xf32>
    %128 = vector.broadcast %127 : vector<1x8x1xf32> to vector<1x8x8xf32>
    %129 = arith.mulf %124, %128 : vector<1x8x8xf32>
    %130 = arith.truncf %129 : vector<1x8x8xf32> to vector<1x8x8xbf16>
    "tpu.trace_start"() <{level = 10 : i32, message = "bqk,bkd->bqd"}> : () -> ()
    %cst_34 = arith.constant dense<0.000000e+00> : vector<1x8x8xf32>
    %131 = tpu.matmul %130, %114, %cst_34 {dimension_numbers = #tpu.dot_dimension_numbers<[2], [1], [1], [2], [0, 0, 0, 1, 1, 2], [0], [0]>} : vector<1x8x8xbf16>, vector<1x8x8xbf16>, vector<1x8x8xf32> -> vector<1x8x8xf32>
    "tpu.trace_stop"() : () -> ()
    %132 = tpu.concatenate %62, %85, %108, %131 in 2 : vector<1x8x8xf32>, vector<1x8x8xf32>, vector<1x8x8xf32>, vector<1x8x8xf32> -> vector<1x8x32xf32>
    %133 = vector.shape_cast %132 : vector<1x8x32xf32> to vector<8x32xf32>
    %134 = arith.truncf %133 : vector<8x32xf32> to vector<8x32xbf16>
    %c0_35 = arith.constant 0 : index
    %c0_36 = arith.constant 0 : index
    %135 = vector.load %arg4[%c0_35, %c0_36] : memref<32x32xbf16, #tpu.memory_space<vmem>>, vector<32x32xbf16>
    %cst_37 = arith.constant dense<0.000000e+00> : vector<8x32xf32>
    %136 = tpu.matmul %134, %135, %cst_37 {dimension_numbers = #tpu.dot_dimension_numbers<[1], [0], [0], [1], [0, 0, 1, 1], [], []>} : vector<8x32xbf16>, vector<32x32xbf16>, vector<8x32xf32> -> vector<8x32xf32>
    %137 = arith.addf %14, %136 : vector<8x32xf32>
    %138 = arith.mulf %137, %137 : vector<8x32xf32>
    %cst_38 = arith.constant dense<0.000000e+00> : vector<8xf32>
    %139 = vector.multi_reduction <add>, %138, %cst_38 [1] : vector<8x32xf32> to vector<8xf32>
    %140 = vector.shape_cast %139 : vector<8xf32> to vector<8x1xf32>
    %cst_39 = arith.constant 3.200000e+01 : f32
    %141 = vector.broadcast %cst_39 : f32 to vector<8x1xf32>
    %142 = arith.divf %140, %141 : vector<8x1xf32>
    %cst_40 = arith.constant 9.99999993E-9 : f32
    %143 = vector.broadcast %cst_40 : f32 to vector<8x1xf32>
    %144 = arith.addf %142, %143 : vector<8x1xf32>
    %145 = math.rsqrt %144 : vector<8x1xf32>
    %146 = vector.broadcast %145 : vector<8x1xf32> to vector<8x32xf32>
    %147 = arith.mulf %137, %146 : vector<8x32xf32>
    %148 = vector.broadcast %2 : vector<1x32xf32> to vector<8x32xf32>
    %149 = arith.mulf %147, %148 : vector<8x32xf32>
    %150 = arith.truncf %149 : vector<8x32xf32> to vector<8x32xbf16>
    %c0_41 = arith.constant 0 : index
    %c0_42 = arith.constant 0 : index
    %151 = vector.load %arg5[%c0_41, %c0_42] : memref<32x32xbf16, #tpu.memory_space<vmem>>, vector<32x32xbf16>
    %cst_43 = arith.constant dense<0.000000e+00> : vector<8x32xf32>
    %152 = tpu.matmul %150, %151, %cst_43 {dimension_numbers = #tpu.dot_dimension_numbers<[1], [0], [0], [1], [0, 0, 1, 1], [], []>} : vector<8x32xbf16>, vector<32x32xbf16>, vector<8x32xf32> -> vector<8x32xf32>
    %c0_44 = arith.constant 0 : index
    %c0_45 = arith.constant 0 : index
    %153 = vector.load %arg6[%c0_44, %c0_45] : memref<1x32xf32, #tpu.memory_space<vmem>>, vector<1x32xf32>
    %154 = vector.broadcast %153 : vector<1x32xf32> to vector<8x32xf32>
    %155 = arith.addf %152, %154 : vector<8x32xf32>
    %156 = arith.truncf %155 : vector<8x32xf32> to vector<8x32xbf16>
    %c0_46 = arith.constant 0 : index
    %c0_47 = arith.constant 0 : index
    %157 = vector.load %arg7[%c0_46, %c0_47] : memref<32x64xbf16, #tpu.memory_space<vmem>>, vector<32x64xbf16>
    %cst_48 = arith.constant dense<0.000000e+00> : vector<8x64xf32>
    %158 = tpu.matmul %156, %157, %cst_48 {dimension_numbers = #tpu.dot_dimension_numbers<[1], [0], [0], [1], [0, 0, 1, 1], [], []>} : vector<8x32xbf16>, vector<32x64xbf16>, vector<8x64xf32> -> vector<8x64xf32>
    %c0_49 = arith.constant 0 : index
    %c0_50 = arith.constant 0 : index
    %159 = vector.load %arg8[%c0_49, %c0_50] : memref<1x64xf32, #tpu.memory_space<vmem>>, vector<1x64xf32>
    %160 = vector.broadcast %159 : vector<1x64xf32> to vector<8x64xf32>
    %161 = arith.addf %158, %160 : vector<8x64xf32>
    %162 = vector.extract_strided_slice %161 {offsets = [0, 0], sizes = [8, 32], strides = [1, 1]} : vector<8x64xf32> to vector<8x32xf32>
    %163 = vector.extract_strided_slice %161 {offsets = [0, 32], sizes = [8, 32], strides = [1, 1]} : vector<8x64xf32> to vector<8x32xf32>
    %c0_51 = arith.constant 0 : index
    %c0_52 = arith.constant 0 : index
    %164 = vector.load %arg9[%c0_51, %c0_52] : memref<1x1xf32, #tpu.memory_space<vmem>>, vector<1x1xf32>
    %165 = vector.broadcast %164 : vector<1x1xf32> to vector<8x32xf32>
    %166 = arith.mulf %165, %162 : vector<8x32xf32>
    %167 = arith.negf %166 : vector<8x32xf32>
    %168 = math.exp %167 : vector<8x32xf32>
    %cst_53 = arith.constant 1.000000e+00 : f32
    %169 = vector.broadcast %cst_53 : f32 to vector<8x32xf32>
    %170 = arith.addf %169, %168 : vector<8x32xf32>
    %171 = arith.divf %169, %170 : vector<8x32xf32>
    %172 = arith.mulf %162, %171 : vector<8x32xf32>
    %173 = arith.mulf %172, %163 : vector<8x32xf32>
    %174 = arith.addf %149, %173 : vector<8x32xf32>
    %175 = vector.shape_cast %174 : vector<8x32xf32> to vector<1x8x32xf32>
    %c0_54 = arith.constant 0 : index
    %c0_55 = arith.constant 0 : index
    %c0_56 = arith.constant 0 : index
    %176 = vector.load %arg12[%c0_54, %c0_55, %c0_56] : memref<1x8x32xf32, #tpu.memory_space<vmem>>, vector<1x8x32xf32>
    tpu.vector_store %arg12[%c0_54, %c0_55, %c0_56], %175 {strides = array<i32>} : memref<1x8x32xf32, #tpu.memory_space<vmem>>, vector<1x8x32xf32>,
    return
  }
  func.func @transform_0(%arg0: i32) -> (i32, i32, i32) {
    %c0_i32 = arith.constant 0 : i32
    %c0_i32_0 = arith.constant 0 : i32
    %c0_i32_1 = arith.constant 0 : i32
    return %arg0, %c0_i32, %c0_i32_0 : i32, i32, i32
  }
  func.func @transform_1(%arg0: i32) -> (i32, i32) {
    %c0_i32 = arith.constant 0 : i32
    %c0_i32_0 = arith.constant 0 : i32
    %c0_i32_1 = arith.constant 0 : i32
    return %c0_i32, %c0_i32_0 : i32, i32
  }
  func.func @transform_2(%arg0: i32) -> (i32, i32) {
    %c0_i32 = arith.constant 0 : i32
    %c0_i32_0 = arith.constant 0 : i32
    %c0_i32_1 = arith.constant 0 : i32
    return %c0_i32, %c0_i32_0 : i32, i32
  }
  func.func @transform_3(%arg0: i32) -> (i32, i32) {
    %c0_i32 = arith.constant 0 : i32
    %c0_i32_0 = arith.constant 0 : i32
    %c0_i32_1 = arith.constant 0 : i32
    return %c0_i32, %c0_i32_0 : i32, i32
  }
  func.func @transform_4(%arg0: i32) -> (i32, i32) {
    %c0_i32 = arith.constant 0 : i32
    %c0_i32_0 = arith.constant 0 : i32
    %c0_i32_1 = arith.constant 0 : i32
    return %c0_i32, %c0_i32_0 : i32, i32
  }
  func.func @transform_5(%arg0: i32) -> (i32, i32) {
    %c0_i32 = arith.constant 0 : i32
    %c0_i32_0 = arith.constant 0 : i32
    %c0_i32_1 = arith.constant 0 : i32
    return %c0_i32, %c0_i32_0 : i32, i32
  }
  func.func @transform_6(%arg0: i32) -> (i32, i32) {
    %c0_i32 = arith.constant 0 : i32
    %c0_i32_0 = arith.constant 0 : i32
    %c0_i32_1 = arith.constant 0 : i32
    return %c0_i32, %c0_i32_0 : i32, i32
  }
  func.func @transform_7(%arg0: i32) -> (i32, i32) {
    %c0_i32 = arith.constant 0 : i32
    %c0_i32_0 = arith.constant 0 : i32
    %c0_i32_1 = arith.constant 0 : i32
    return %c0_i32, %c0_i32_0 : i32, i32
  }
  func.func @transform_8(%arg0: i32) -> (i32, i32) {
    %c0_i32 = arith.constant 0 : i32
    %c0_i32_0 = arith.constant 0 : i32
    %c0_i32_1 = arith.constant 0 : i32
    return %c0_i32, %c0_i32_0 : i32, i32
  }
  func.func @transform_9(%arg0: i32) -> (i32, i32) {
    %c0_i32 = arith.constant 0 : i32
    %c0_i32_0 = arith.constant 0 : i32
    %c0_i32_1 = arith.constant 0 : i32
    return %c0_i32, %c0_i32_0 : i32, i32
  }
  func.func @transform_10(%arg0: i32) -> (i32, i32) {
    %c0_i32 = arith.constant 0 : i32
    %c0_i32_0 = arith.constant 0 : i32
    %c0_i32_1 = arith.constant 0 : i32
    return %c0_i32, %c0_i32_0 : i32, i32
  }
  func.func @transform_11(%arg0: i32) -> (i32, i32, i32) {
    %c0_i32 = arith.constant 0 : i32
    %c0_i32_0 = arith.constant 0 : i32
    %c0_i32_1 = arith.constant 0 : i32
    return %arg0, %c0_i32, %c0_i32_0 : i32, i32, i32
  }
}

</mosaic_0001>

<bundles_post_ra>
// kernel: tpu_custom_call.1
= control target key start
LH: loop header
LB: loop body
LE: loop exit
PB: predicated region body
PF: predicated region fallthrough
CT: control target
= control target key end

     0   :  { %s2388_s0 = inlined_call_operand.hbm [shape: f32[2,8,32], index: 0, kind: input, shape index: {}]   ;;  %s2389_s1 = inlined_call_operand.vmem [shape: f32[1,32], index: 1, kind: input, shape index: {}]   ;;  %s2390_s2 = inlined_call_operand.hbm [shape: bf16[32,160], index: 2, kind: input, shape index: {}]   ;;  %s2391_s3 = inlined_call_operand.hbm [shape: bf16[32,32], index: 3, kind: input, shape index: {}]   ;;  %s2392_s4 = inlined_call_operand.vmem [shape: bf16[32,32], index: 4, kind: input, shape index: {}]   ;;  %s2393_s5 = inlined_call_operand.vmem [shape: f32[1,32], index: 5, kind: input, shape index: {}]   ;;  %s2394_s6 = inlined_call_operand.hbm [shape: bf16[32,64], index: 6, kind: input, shape index: {}]   ;;  %s2395_s7 = inlined_call_operand.hbm [shape: f32[1,64], index: 7, kind: input, shape index: {}]   ;;  %s2396_s8 = inlined_call_operand.<no memory space> [shape: f32[1,1], index: 8, kind: input, shape index: {}]   ;;  %s2397_s9 = inlined_call_operand.vmem [shape: f32[8,32], index: 9, kind: input, shape index: {}]   ;;  %s2398_s10 = inlined_call_operand.vmem [shape: f32[8,32], index: 10, kind: input, shape index: {}]   ;;  %s2399_s11 = inlined_call_operand.hbm [shape: f32[2,8,32], index: 11, kind: output, shape index: {}]  }
   0x1   :  { %2404 = sst [smem:[#allocation17_spill]] %s2390_s2  ;;  %v16_v0 = vstv %s2396_s8 }
   0x2   :  { %2405 = sst [smem:[#allocation18_spill]] %s2393_s5  ;;  %17 = vst [vmem:[#allocation2] sm:$0x1] %v16_v0 }
   0x3   :  { %2406 = sst [smem:[#allocation19_spill]] %s2399_s11 }
   0x4   :  { %18 = vsyncpa [#allocation4], 0 }
   0x5   :  { %20 = vsyncpa [#allocation4 + $0x1], 0 }
   0x6   :  { %21 = vsyncpa [#allocation7], 0 }
   0x7   :  { %22 = vsyncpa [#allocation10], 0 }
   0x8   :  { %23 = vsyncpa [#allocation5], 0 }
   0x9   :  { %25 = vsyncpa [#allocation5 + $0x1], 0  ;;  %s2003_s19 = smov 0   ;;  %s2005_s20 = smov 0  }
   0xa   :  { %s2007_s21 = smov 0   ;;  %s2009_s22 = smov 0  }
   0xb LB: > { %s1911_s8 = smov [#allocation6]   ;;  %s2024_s24 = sadd.s32 4294967295, %s1909_s22   ;;  %s1909_s22 = sphi %s2009_s22, %s2430_s22   ;;  %s1905_s21 = sphi %s2007_s21, %s2429_s21   ;;  %s1901_s20 = sphi %s2005_s20, %s2428_s20   ;;  %s1897_s19 = sphi %s2003_s19, %s2427_s19  }
   0xc   : > { %s313_s23 = sshll.u32 %s1911_s8, 4  ;;  %p1402_p0 = scmp.ge.s32.totalorder %s1909_s22, 1  ;;  %s2029_s23 = int_to_ptr.vmem [resolvable:$true] %s313_s23 }
   0xd   : > { %p2401_p1 = scmp.eq.s32.totalorder %s2024_s24, 0  ;;  %p298_p2 = scmp.lt.s32.totalorder %s1909_s22, 3 }
   0xe   : > { %s1912_s27 = smov [#allocation9]   ;;  %s1913_s29 = smov [#allocation8]  }
   0xf   : > { %p2031_p3 = pnand %p1402_p0, %p298_p2  ;;  %s345_s28 = sshll.u32 %s1912_s27, 4  ;;  %s2044_s28 = int_to_ptr.vmem [resolvable:$true] %s345_s28 }
  0x10   : > { %s2046_s30 = sshll.u32 %s1913_s29, 4  ;;  %s2409_s2 = sld [smem:[#allocation17_spill]]  ;;  %s327_s30 = int_to_ptr.vmem [resolvable:$true] %s2046_s30 }
  0x11   : > { %s2407_s25 = scalar_select %p2031_p3, 1, 0 }
  0x12   : > { %p1565_p5 = pneg %p2031_p3 }
  0x14   : > { %p2040_p6 = pnand %p1565_p5, %p2401_p1 }
  0x16   : > { %s1693_s14 = scalar_lea.hbm %s2409_s2, 512  ;;  %p2056_p8 = pneg %p2040_p6 }
  0x17   : > { %p1694_p7 = scmp.ne.s32.totalorder %s2409_s2, %s1693_s14  ;;  %p1700_p11 = scmp.lt.u32.totalorder %s1693_s14, %s2409_s2 }
  0x19   : > { %p1696_p9 = pnand %p2056_p8, %p1694_p7 }
  0x1b   : > { %p1697_p10 = pneg %p1696_p9 }
  0x1d   : > { %p1702_p12 = pnand %p1700_p11, %p1697_p10 }
  0x1f   : > { %1705 = shalt.err (!%p1702_p12)
}
  0x20   : > { %s1706_s27 = scalar_lea.vmem %s2029_s23, 512  ;;  %p1714_p5 = scmp.lt.s32.totalorder %s2029_s23, %s2029_s23 }
  0x21   : > { %p1707_p13 = scmp.ne.s32.totalorder %s2029_s23, %s1706_s27  ;;  %p1715_p4 = scmp.lt.s32.totalorder %s1706_s27, %s1706_s27 }
  0x23   : > { %p1709_p0 = pnand %p1707_p13, %p2056_p8  ;;  %p1716_p7 = por %p1715_p4, %p1714_p5 }
  0x25   : > { %p1710_p2 = pneg %p1709_p0 }
  0x27   : > { %p1717_p9 = pnand %p1716_p7, %p1710_p2 }
  0x29   : > { %1720 = shalt.err (!%p1717_p9)
}
  0x2a   : > { %s1914_s29 = smov 128   ;;  %s1915_s12 = smov 8  }
  0x2b   : > { %1568 = dma.hbm_to_vmem [thread:$0]  (!%p2040_p6), %s2409_s2, 512, %s2029_s23, [#allocation7], %s1914_s29, %s1914_s29, %s1915_s12  }
  0x2c   : > { %s1721_s18 = scalar_lea.hbm %s2394_s6, 256 }
  0x2d   : > { %p1722_p4 = scmp.ne.s32.totalorder %s2394_s6, %s1721_s18  ;;  %p1728_p12 = scmp.lt.u32.totalorder %s1721_s18, %s2394_s6 }
  0x2f   : > { %p1724_p10 = pnand %p1722_p4, %p2056_p8 }
  0x31   : > { %p1725_p11 = pneg %p1724_p10 }
  0x33   : > { %p1730_p13 = pnand %p1728_p12, %p1725_p11 }
  0x35   : > { %1733 = shalt.err (!%p1730_p13)
}
  0x36   : > { %s1734_s23 = scalar_lea.vmem %s2044_s28, 256  ;;  %p1742_p7 = scmp.lt.s32.totalorder %s2044_s28, %s2044_s28 }
  0x37   : > { %p1735_p0 = scmp.ne.s32.totalorder %s2044_s28, %s1734_s23  ;;  %p1743_p9 = scmp.lt.s32.totalorder %s1734_s23, %s1734_s23 }
  0x39   : > { %p1737_p2 = pnand %p1735_p0, %p2056_p8  ;;  %p1744_p4 = por %p1743_p9, %p1742_p7 }
  0x3b   : > { %p1738_p5 = pneg %p1737_p2 }
  0x3d   : > { %p1745_p10 = pnand %p1744_p4, %p1738_p5 }
  0x3f   : > { %1748 = shalt.err (!%p1745_p10)
}
  0x40   : > { %s1916_s11 = smov 64   ;;  %s1917_s5 = smov 4  }
  0x41   : > { %1574 = dma.hbm_to_vmem [thread:$0]  (!%p2040_p6), %s2394_s6, 256, %s2044_s28, [#allocation10], %s1916_s11, %s1916_s11, %s1917_s5  }
  0x42   : > { %s1749_s15 = scalar_lea.hbm %s2391_s3, 256 }
  0x43   : > { %p1750_p11 = scmp.ne.s32.totalorder %s2391_s3, %s1749_s15  ;;  %p1756_p0 = scmp.lt.u32.totalorder %s1749_s15, %s2391_s3 }
  0x45   : > { %p1752_p12 = pnand %p1750_p11, %p2056_p8 }
  0x47   : > { %p1753_p13 = pneg %p1752_p12 }
  0x49   : > { %p1758_p2 = pnand %p1756_p0, %p1753_p13 }
  0x4b   : > { %1761 = shalt.err (!%p1758_p2)
}
  0x4c   : > { %s1762_s23 = scalar_lea.vmem %s327_s30, 256  ;;  %p1770_p4 = scmp.lt.s32.totalorder %s327_s30, %s327_s30 }
  0x4d   : > { %p1763_p5 = scmp.ne.s32.totalorder %s327_s30, %s1762_s23  ;;  %p1771_p10 = scmp.lt.s32.totalorder %s1762_s23, %s1762_s23 }
  0x4f   : > { %p1765_p7 = pnand %p1763_p5, %p2056_p8  ;;  %p1772_p1 = por %p1771_p10, %p1770_p4 }
  0x51   : > { %p1766_p9 = pneg %p1765_p7 }
  0x53   : > { %p1773_p3 = pnand %p1772_p1, %p1766_p9 }
  0x55   : > { %1776 = shalt.err (!%p1773_p3)
}
  0x56   : > { %1571 = dma.hbm_to_vmem [thread:$0]  (!%p2040_p6), %s2391_s3, 256, %s327_s30, [#allocation7], %s1916_s11, %s1916_s11, %s1917_s5  }
  0x57   : > { %s1918_s12 = smov [#allocation11]   ;;  %s1777_s16 = scalar_lea.hbm %s2395_s7, 16 }
  0x58   : > { %s359_s13 = sshll.u32 %s1918_s12, 4  ;;  %p1778_p11 = scmp.ne.s32.totalorder %s2395_s7, %s1777_s16  ;;  %s360_s13 = int_to_ptr.vmem [resolvable:$true] %s359_s13 }
  0x59   : > { %p1784_p12 = scmp.lt.u32.totalorder %s1777_s16, %s2395_s7 }
  0x5a   : > { %p1780_p1 = pnand %p1778_p11, %p2056_p8 }
  0x5c   : > { %p1781_p3 = pneg %p1780_p1 }
  0x5e   : > { %p1786_p13 = pnand %p1784_p12, %p1781_p3 }
  0x60   : > { %1789 = shalt.err (!%p1786_p13)
}
  0x61   : > { %s1790_s30 = scalar_lea.vmem %s360_s13, 16  ;;  %s1797_s11 = scalar_lea.vmem %s360_s13, 32 }
  0x62   : > { %p1791_p0 = scmp.ne.s32.totalorder %s360_s13, %s1790_s30  ;;  %p1798_p7 = scmp.lt.s32.totalorder %s360_s13, %s360_s13 }
  0x63   : > { %p1799_p9 = scmp.lt.s32.totalorder %s1797_s11, %s1790_s30 }
  0x64   : > { %p1793_p2 = pnand %p1791_p0, %p2056_p8 }
  0x65   : > { %p1800_p4 = por %p1799_p9, %p1798_p7 }
  0x66   : > { %p1794_p5 = pneg %p1793_p2 }
  0x68   : > { %p1801_p10 = pnand %p1800_p4, %p1794_p5 }
  0x6a   : > { %1804 = shalt.err (!%p1801_p10)
}
  0x6b   : > { %1577 = dma.hbm_to_vmem [thread:$0]  (!%p2040_p6), %s2395_s7, 16, %s360_s13, [#allocation10]  }
  0x6c   : > { %s1401_s17 = sadd.s32 4294967294, %s1909_s22   ;;  %s2139_s26 = sadd.s32 1, %s1909_s22  }
  0x6d   : > { %s35_s29 = ssub.s32 %s1909_s22, %s2139_s26  ;;  %s38_s12 = sadd.s32 1, %s1905_s21 }
  0x6e   : > { %p36_p8 = scmp.eq.s32.totalorder %s35_s29, 0  ;;  %p45_p11 = scmp.ne.s32.totalorder %s1905_s21, %s1901_s20 }
  0x6f   : > { %p46_p1 = scmp.eq.s32.totalorder %s1909_s22, 0  ;;  %p51_p3 = scmp.ne.s32.totalorder %s1901_s20, %s1897_s19 }
  0x70   : > { %s2150_s14 = scalar_select %p36_p8, %s1905_s21, %s38_s12  }
  0x71   : > { %p2152_p12 = por %p46_p1, %p45_p11  ;;  %p2412_p13 = scmp.eq.s32.totalorder %s2024_s24, 0 }
  0x72   : > { %p285_p0 = scmp.eq.s32.totalorder %s2024_s24, 1  ;;  %p291_p2 = scmp.eq.s32.totalorder %s1401_s17, 1 }
  0x73   : > { %p2158_p6 = por %p2412_p13, %p51_p3  ;;  %p1590_p5 = scmp.lt.s32.totalorder %s1909_s22, 2 }
  0x74   : > { %s379_s16 = sand.u32 1, %s1905_s21   ;;  %p2165_p7 = por %p285_p0, %p45_p11 }
  0x75   : > { %p2169_p9 = por %p291_p2, %p51_p3  ;;  %s1408_s27 = sshll.u32 %s379_s16, 3 }
  0x76   : > { %s2414_s18 = scalar_select %p2165_p7, 1, 0 }
  0x77   : > { %s2415_s8 = scalar_select %p2169_p9, 1, 0 }
  0x78   : > { %s1409_s23 = sshll.u32 %s1909_s22, 7  ;;  %s383_s28 = scalar_lea.vmem [#allocation3], %s1408_s27 }
  0x79   : > { %s2177_s5 = scalar_lea.hbm %s2388_s0, %s1409_s23  ;;  %s390_s17 = sshll.u32 %s383_s28, 4  ;;  %s2179_s17 = int_to_ptr.vmem [resolvable:$true] %s390_s17 }
  0x7a   : > { %p2183_p4 = pnand %p1590_p5, %p2152_p12  ;;  %s380_s12 = scalar_lea.sflag [#allocation4], %s379_s16 }
  0x7b   : > { %s1805_s2 = scalar_lea.hbm %s2177_s5, 128  ;;  %s1810_s30 = scalar_lea.hbm %s2388_s0, 256 }
  0x7c   : > { %p1806_p10 = scmp.ne.s32.totalorder %s2177_s5, %s1805_s2  ;;  %p1807_p8 = pneg %p2183_p4 }
  0x7d   : > { %p1811_p3 = scmp.lt.u32.totalorder %s2177_s5, %s2388_s0  ;;  %p1812_p12 = scmp.lt.u32.totalorder %s1810_s30, %s1805_s2 }
  0x7e   : > { %p1808_p11 = pnand %p1807_p8, %p1806_p10  ;;  %p1814_p0 = scmp.lt.u32.totalorder %s1805_s2, %s2177_s5 }
  0x7f   : > { %p1813_p13 = por %p1812_p12, %p1811_p3 }
  0x80   : > { %p1809_p1 = pneg %p1808_p11 }
  0x81   : > { %p1815_p2 = por %p1814_p0, %p1813_p13 }
  0x83   : > { %p1816_p5 = pnand %p1815_p2, %p1809_p1 }
  0x85   : > { %1819 = shalt.err (!%p1816_p5)
}
  0x86   : > { %s1820_s16 = scalar_lea.vmem %s2179_s17, 128  ;;  %s1919_s28 = smov [#allocation3]  }
  0x87   : > { %p1821_p10 = scmp.ne.s32.totalorder %s2179_s17, %s1820_s16  ;;  %s1825_s27 = sshll.u32 %s1919_s28, 4  ;;  %s1826_s27 = int_to_ptr.vmem [resolvable:$false] %s1825_s27 }
  0x88   : > { %s1827_s23 = scalar_lea.vmem %s1826_s27, 256  ;;  %p1828_p7 = scmp.lt.s32.totalorder %s2179_s17, %s1826_s27 }
  0x89   : > { %p1823_p11 = pnand %p1821_p10, %p1807_p8  ;;  %p1829_p3 = scmp.lt.s32.totalorder %s1827_s23, %s1820_s16 }
  0x8b   : > { %p1824_p9 = pneg %p1823_p11  ;;  %p1830_p12 = por %p1829_p3, %p1828_p7 }
  0x8d   : > { %p1831_p13 = pnand %p1830_p12, %p1824_p9 }
  0x8f   : > { %1834 = shalt.err (!%p1831_p13)
}
  0x90   : > { %1581 = dma.hbm_to_vmem [thread:$0]  (!%p2183_p4), %s2177_s5, 128, %s2179_s17, %s380_s12  }
  0x91   : > { %p2417_p1 = scmp.ne.s32.totalorder %s2407_s25, 0 }
  0x92   : > { %s2215_s2 = sand.u32 (!%p2417_p1), 1, %s1901_s20  }
  0x93   : > { %399 = sbr.rel (%p2417_p1) target bundleno = 2652 (0xa5c), region = 64  ;;  %s1411_s30 = sshll.u32 (!%p2417_p1), %s2215_s2, 3 }
  0x94   : > { %s402_s15 = scalar_lea.sflag (!%p2417_p1), [#allocation4], %s2215_s2  ;;  %s405_s11 = scalar_lea.vmem (!%p2417_p1), [#allocation3], %s1411_s30 }
  0x9a   : > { %1880 = dma.done.wait (%p2158_p6), %s402_s15, 128  }
  0x9b   : > { %1882 = vsyncadd (%p2158_p6), %s402_s15, 4294967168  ;;  %p2418_p7 = scmp.eq.s32.totalorder %s2024_s24, 0 }
  0x9d   : > { %1884 = dma.done.wait (%p2418_p7), [#allocation7], 768   ;;  %p2419_p9 = pmov %p2418_p7 }
  0x9e   : > { %p2420_p4 = pmov %p2418_p7 }
  0x9f   : > { %1886 = vsyncadd (%p2419_p9), [#allocation7], 4294966528 }
  0xa0   : > { %1888 = dma.done.wait (%p2420_p4), [#allocation10], 272   ;;  %p2421_p8 = pmov %p2420_p4 }
  0xa1   : > { %v461_v1 = vld [vmem:[%s405_s11] sm:$0xff]  ;;  %vm464_vm0 = vcmask 261120   ;;  %v1657_v4 = vld [vmem:[#allocation6 + $0x4] ss:$8 sps:$4 sm:$0xff]   ;;  %v1659_v5 = vld [vmem:[#allocation6] ss:$8 sps:$4 sm:$0xff]   ;;  %v573_v47 = vlaneseq }
  0xa2   : > { %1890 = vsyncadd (%p2421_p8), [#allocation10], 4294967024  ;;  %v463_v2 = vmul.f32 %v461_v1, %v461_v1  ;;  %v1660_v6 = vld [vmem:[#allocation6 + $0x14] ss:$8 sps:$4 sm:$0xff]   ;;  %508 = vmatprep.subr.bf16.mxu0 %v1657_v4  ;;  %v1920_v7 = vmov 0   ;;  %s1921_s29 = smov 32  }
  0xa3   : > { %540 = vmatprep.mubr.bf16.mxu0 %v1920_v7  ;;  %509 = vmatpush1.bf16.msra.mxu0 %v1659_v5  ;;  %v1662_v8 = vld [vmem:[#allocation6 + $0x10] ss:$8 sps:$4 sm:$0xff]   ;;  %s1922_s12 = smov 96   ;;  %v2244_v15 = vld [vmem:[%s2389_s1] ss:$0 sm:$0xff]  ;;  %v1923_v26 = vmov 0.0  }
  0xa4   : > { %v465_v3 = vsel %vm464_vm0, %v463_v2, 0.0  ;;  %1655 = vset.pattern.permute.xlu1 %v1920_v7  ;;  %510 = vmatprep.subr.bf16.mxu0 %v1660_v6  ;;  %v549_v9 = vld [vmem:[%s2397_s9] sm:$0xff]  ;;  %vm1924_vm1 = vmmov 0   ;;  %s1925_s27 = smov 88   ;;  %s1926_s23 = smov 112   ;;  %vm585_vm2 = vcmask 64512  }
  0xa5   : > { %466 = vadd.xlane.f32.xlu0 %v465_v3  ;;  %v550_v10 = vld [vmem:[%s2398_s10] sm:$0xff]  ;;  %563 = vrot.lane.b32.xlu1 %v549_v9, %s1921_s29  ;;  %s1927_s15 = smov 104   ;;  %s1928_s11 = smov 120   ;;  %v574_v48 = vshrl.u32 %v573_v47, 7  ;;  %v576_v49 = vand.u32 127, %v573_v47  ;;  %vm652_vm4 = vcmask 1043456  }
  0xa6   : > { %1656 = vset.pattern.permute.xlu0 %v1920_v7  ;;  %1473 = vmatprep.subr.bf16.mxu1 %v1923_v26  ;;  %s1929_s25 = smov 80   ;;  %s1930_s13 = smov 72   ;;  %v1931_v51 = vmov -1e+30   ;;  %vm1046_vm5 = vcmask 130048   ;;  %vm1048_vm6 = vcmask 195584  }
  0xa7   : > { %511 = vmatpush1.bf16.msra.mxu0 %v1662_v8  ;;  %1475 = vmatprep.mubr.msk.bf16.mxu1 %vm1924_vm1, %v1923_v26  ;;  %vm577_vm3 = vcmp.le.s32.totalorder %v576_v49, %v574_v48  ;;  %s1932_s5 = smov 56   ;;  %s1933_s17 = smov 64  }
  0xa8   : > { %1479 = vmatprep.subr.bf16.mxu0 %v1923_v26  ;;  %v578_v52 = vsel %vm577_vm3, 0.0, %v1931_v51  ;;  %s1935_s16 = smov 48   ;;  %s1936_s28 = smov 8  }
  0xa9   : > { %p2424_p0 = scmp.ne.s32.totalorder %s2414_s18, 0 }
  0xbb   : > { %553 = vrot.lane.b32.xlu0 %v550_v10, %s1922_s12 }
 0x117   : > { %v564_v27 = vpop.permute.xlu1 %563 }
 0x132   : > { %v467_v11 = vpop.xlane.xlu0 %466 }
 0x133   : > { %v469_v12 = vmul.f32 0.03125, %v467_v11 }
 0x135   : > { %v470_v13 = vadd.f32 1e-08, %v469_v12 }
 0x136   : > { %v554_v23 = vpop.permute.xlu0 %553 }
 0x137   : > { %1669 = vrsqrt.f32 %v470_v13 }
 0x141   : > { %v1670_v14 = vpop.eup %1669 }
 0x142   : > { %v472_v16 = vmul.f32 %v1670_v14, %v461_v1 }
 0x144   : > { %v2247_v17 = vmul.f32 %v2244_v15, %v472_v16 }
 0x146   : > { %v480_v18 = vpack.c.bf16 %v2247_v17, %v2247_v17 }
 0x148   : > { %1422 = vmatmul.mubr.msk.bf16.vlgmr.msra.gmra.mrb[0].mxu0 %vm464_vm0, %v480_v18 }
 0x149   : > { %1481 = vmatprep.mubr.msk.bf16.mxu0 %vm1924_vm1, %v1923_v26 }
 0x21b   : > { %v2252_v19 = vpop.f32.mrb[0].mxu0 }
 0x21c   : > { %v544_v20 = vpop.f32.mrb[1].mxu0  ;;  %v556_v25 = vmul.f32 %v554_v23, %v2252_v19  ;;  %v566_v28 = vmul.f32 %v564_v27, %v2252_v19  ;;  %v551_v32 = vmul.f32 %v549_v9, %v2252_v19 }
 0x21d   : > { %v567_v21 = vmul.f32 %v550_v10, %v544_v20  ;;  %v546_v22 = vpop.f32.mrb[2].mxu0 }
 0x21e   : > { %v547_v24 = vpop.f32.mrb[3].mxu0 }
 0x21f   : > { %569 = vrot.lane.b32.xlu1 %v567_v21, %s1921_s29 }
 0x223   : > { %558 = vrot.lane.b32.xlu1 %v556_v25, %s1921_s29  ;;  %s1934_s29 = smov 40  }
 0x291   : > { %v570_v29 = vpop.permute.xlu1 %569 }
 0x292   : > { %v572_v30 = vadd.f32 %v570_v29, %v566_v28 }
 0x294   : > { %v580_v31 = vpack.c.bf16 %v572_v30, %v572_v30 }
 0x295   : > { %v559_v33 = vpop.permute.xlu1 %558 }
 0x296   : > { %v561_v34 = vadd.f32 %v559_v33, %v551_v32  ;;  %583 = vrot.lane.b32.xlu1 %v580_v31, %s1922_s12 }
 0x298   : > { %v579_v35 = vpack.c.bf16 %v561_v34, %v561_v34 }
 0x29a   : > { %699 = vrot.lane.b32.xlu1 %v580_v31, %s1925_s27  ;;  %809 = vrot.lane.b32.xlu0 %v579_v35, %s1926_s23  ;;  %s1937_s27 = smov 16   ;;  %s1938_s23 = smov 24  }
 0x29e   : > { %921 = vrot.lane.b32.xlu0 %v579_v35, %s1927_s15  ;;  %697 = vrot.lane.b32.xlu1 %v579_v35, %s1928_s11  ;;  %s2423_s15 = sld [smem:[#allocation19_spill]] }
 0x2a2   : > { %811 = vrot.lane.b32.xlu1 %v580_v31, %s1929_s25  ;;  %s1280_s25 = scalar_lea.sflag [#allocation5], %s2215_s2 }
 0x2a6   : > { %923 = vrot.lane.b32.xlu1 %v580_v31, %s1930_s13 }
 0x308   : > { %v584_v36 = vpop.permute.xlu1 %583 }
 0x309   : > { %v590_v37 = vsel %vm585_vm2, %v584_v36, 0 }
 0x30a   : > { %1474 = vmatpush3.bf16.xpose.msra.mxu1 %v590_v37 }
 0x30b   : > { %1485 = vmatprep.subr.bf16.mxu1 %v1923_v26 }
 0x30c   : > { %v700_v38 = vpop.permute.xlu1 %699  ;;  %v810_v44 = vpop.permute.xlu0 %809 }
 0x30d   : > { %v705_v40 = vsel %vm585_vm2, %v700_v38, 0 }
 0x310   : > { %v698_v39 = vpop.permute.xlu1 %697  ;;  %v922_v46 = vpop.permute.xlu0 %921 }
 0x311   : > { %1476 = vmatmul.mubr.msk.bf16.vlgmr.msra.gmra.mrb[0].mxu1 %vm585_vm2, %v579_v35  ;;  %v581_v35 = vpack.c.bf16 %v2252_v19, %v2252_v19 }
 0x312   : > { %1486 = vmatpush3.bf16.xpose.msra.mxu1 %v705_v40  ;;  %1487 = vmatprep.mubr.msk.bf16.mxu1 %vm1924_vm1, %v1923_v26 }
 0x313   : > { %1497 = vmatprep.subr.bf16.mxu1 %v1923_v26 }
 0x314   : > { %v812_v41 = vpop.permute.xlu1 %811 }
 0x315   : > { %v817_v42 = vsel %vm585_vm2, %v812_v41, 0 }
 0x318   : > { %v924_v43 = vpop.permute.xlu1 %923 }
 0x319   : > { %1488 = vmatmul.mubr.msk.bf16.vlgmr.msra.gmra.mrb[4].mxu1 %vm585_vm2, %v698_v39  ;;  %v929_v45 = vsel %vm585_vm2, %v924_v43, 0 }
 0x31a   : > { %1498 = vmatpush3.bf16.xpose.msra.mxu1 %v817_v42  ;;  %1499 = vmatprep.mubr.msk.bf16.mxu1 %vm1924_vm1, %v1923_v26 }
 0x31b   : > { %1509 = vmatprep.subr.bf16.mxu1 %v1923_v26 }
 0x321   : > { %1500 = vmatmul.mubr.msk.bf16.vlgmr.msra.gmra.mrb[8].mxu1 %vm585_vm2, %v810_v44 }
 0x322   : > { %1510 = vmatpush3.bf16.xpose.msra.mxu1 %v929_v45  ;;  %1511 = vmatprep.mubr.msk.bf16.mxu1 %vm1924_vm1, %v1923_v26 }
 0x323   : > { %1521 = vmatprep.subr.bf16.mxu1 %v1923_v26 }
 0x329   : > { %1512 = vmatmul.mubr.msk.bf16.vlgmr.msra.gmra.mrb[12].mxu1 %vm585_vm2, %v922_v46 }
 0x32a   : > { %1525 = vmatprep.mubr.msk.bf16.mxu1 %vm1924_vm1, %v1923_v26 }
 0x3e4   : > { %v626_v50 = vpop.f32.mrb[0].mxu1 }
 0x3e5   : > { %v632_v53 = vmul.f32 0.35355338, %v626_v50  ;;  %v1477_v54 = vpop.f32.mrb[1].mxu1 }
 0x3e6   : > { %v629_v55 = vpop.f32.mrb[2].mxu1 }
 0x3e7   : > { %v1478_v56 = vpop.f32.mrb[3].mxu1  ;;  %v633_v57 = vadd.f32 %v632_v53, %v578_v52 }
 0x3e9   : > { %v634_v58 = vsel %vm585_vm2, %v633_v57, -inf }
 0x3ea   : > { %635 = vmax.xlane.f32.xlu1 %v634_v58 }
 0x3ec   : > { %v741_v59 = vpop.f32.mrb[4].mxu1 }
 0x3ed   : > { %v747_v60 = vmul.f32 0.35355338, %v741_v59  ;;  %v1489_v61 = vpop.f32.mrb[5].mxu1 }
 0x3ee   : > { %v744_v62 = vpop.f32.mrb[6].mxu1 }
 0x3ef   : > { %v1490_v63 = vpop.f32.mrb[7].mxu1  ;;  %v748_v0 = vadd.f32 %v747_v60, %v578_v52 }
 0x3f1   : > { %v749_v1 = vsel %vm585_vm2, %v748_v0, -inf }
 0x3f2   : > { %750 = vmax.xlane.f32.xlu0 %v749_v1 }
 0x3f4   : > { %v853_v2 = vpop.f32.mrb[8].mxu1 }
 0x3f5   : > { %v859_v3 = vmul.f32 0.35355338, %v853_v2  ;;  %v1501_v4 = vpop.f32.mrb[9].mxu1 }
 0x3f6   : > { %v856_v5 = vpop.f32.mrb[10].mxu1 }
 0x3f7   : > { %v1502_v6 = vpop.f32.mrb[11].mxu1  ;;  %v860_v7 = vadd.f32 %v859_v3, %v578_v52 }
 0x3f9   : > { %v861_v8 = vsel %vm585_vm2, %v860_v7, -inf }
 0x3fa   : > { %862 = vmax.xlane.f32.xlu0 %v861_v8  ;;  %v1663_v8 = vld [vmem:[#allocation8] sm:$0xff]  }
 0x3fb   : > { %1522 = vmatpush3.bf16.msra.mxu1 %v1663_v8 }
 0x3fc   : > { %v965_v9 = vpop.f32.mrb[12].mxu1  ;;  %1523 = vmatprep.subr.bf16.mxu1 %v1923_v26 }
 0x3fd   : > { %v971_v10 = vmul.f32 0.35355338, %v965_v9  ;;  %v1513_v11 = vpop.f32.mrb[13].mxu1  ;;  %v1664_v9 = vld [vmem:[#allocation8 + $0x8] sm:$0xff]  }
 0x3fe   : > { %v968_v12 = vpop.f32.mrb[14].mxu1 }
 0x3ff   : > { %v1514_v13 = vpop.f32.mrb[15].mxu1  ;;  %v972_v14 = vadd.f32 %v971_v10, %v578_v52  ;;  %1524 = vmatpush3.bf16.msra.mxu1 %v1664_v9 }
 0x400   : > { %1537 = vmatprep.subr.bf16.mxu1 %v1923_v26 }
 0x401   : > { %v973_v16 = vsel %vm585_vm2, %v972_v14, -inf }
 0x402   : > { %974 = vmax.xlane.f32.xlu1 %v973_v16 }
 0x477   : > { %v636_v18 = vpop.xlane.xlu1 %635 }
 0x478   : > { %v637_v20 = vsub.f32 %v633_v57, %v636_v18 }
 0x47a   : > { %v638_v21 = vmul.f32 1.442695, %v637_v20 }
 0x47c   : > { %1671 = vpow2.f32 %v638_v21 }
 0x47f   : > { %v751_v22 = vpop.xlane.xlu0 %750 }
 0x480   : > { %v752_v23 = vsub.f32 %v748_v0, %v751_v22 }
 0x482   : > { %v753_v24 = vmul.f32 1.442695, %v752_v23 }
 0x484   : > { %1673 = vpow2.f32 %v753_v24 }
 0x486   : > { %v1672_v25 = vpop.eup %1671 }
 0x487   : > { %v863_v27 = vpop.xlane.xlu0 %862  ;;  %v640_v28 = vsel %vm585_vm2, %v1672_v25, 0.0 }
 0x488   : > { %v864_v29 = vsub.f32 %v860_v7, %v863_v27  ;;  %641 = vadd.xlane.f32.xlu0 %v640_v28 }
 0x48a   : > { %v865_v30 = vmul.f32 1.442695, %v864_v29 }
 0x48c   : > { %1675 = vpow2.f32 %v865_v30 }
 0x48e   : > { %v1674_v31 = vpop.eup %1673 }
 0x48f   : > { %v755_v32 = vsel %vm585_vm2, %v1674_v31, 0.0  ;;  %v975_v36 = vpop.xlane.xlu1 %974 }
 0x490   : > { %756 = vadd.xlane.f32.xlu1 %v755_v32  ;;  %v976_v37 = vsub.f32 %v972_v14, %v975_v36  ;;  %v1665_v36 = vld [vmem:[%s2392_s4] sm:$0xff]  }
 0x492   : > { %v977_v38 = vmul.f32 1.442695, %v976_v37  ;;  %v1666_v37 = vld [vmem:[%s2392_s4 + $0x8] sm:$0xff]  }
 0x494   : > { %1677 = vpow2.f32 %v977_v38 }
 0x496   : > { %v1676_v33 = vpop.eup %1675 }
 0x497   : > { %v867_v34 = vsel %vm585_vm2, %v1676_v33, 0.0 }
 0x498   : > { %868 = vadd.xlane.f32.xlu0 %v867_v34 }
 0x49e   : > { %v1678_v39 = vpop.eup %1677 }
 0x49f   : > { %v979_v40 = vsel %vm585_vm2, %v1678_v39, 0.0 }
 0x4a1   : > { %761 = vrot.lane.b32.xlu1 %v581_v35, %s1932_s5 }
 0x4ae   : > { %647 = vrot.lane.b32.xlu0 %v581_v35, %s1933_s17 }
 0x4b2   : > { %985 = vrot.lane.b32.xlu0 %v581_v35, %s1934_s29  ;;  %s2422_s29 = sld [smem:[#allocation18_spill]] }
 0x4c5   : > { %980 = vadd.xlane.f32.xlu1 %v979_v40 }
 0x4d6   : > { %873 = vrot.lane.b32.xlu1 %v581_v35, %s1935_s16  ;;  %s1445_s16 = sshll.u32 %s2024_s24, 7  ;;  %s1939_s24 = smov [#allocation12]  }
 0x4d7   : > { %s2343_s11 = scalar_lea.hbm %s2423_s15, %s1445_s16 }
 0x515   : > { %v642_v41 = vpop.xlane.xlu0 %641 }
 0x516   : > { %1679 = vrcp.f32 %v642_v41 }
 0x51d   : > { %v757_v42 = vpop.xlane.xlu1 %756 }
 0x51e   : > { %1681 = vrcp.f32 %v757_v42 }
 0x520   : > { %v1680_v19 = vpop.eup %1679 }
 0x521   : > { %v644_v44 = vmul.f32 %v1680_v19, %v1672_v25  ;;  %v762_v47 = vpop.permute.xlu1 %761 }
 0x522   : > { %v767_v50 = vsel %vm652_vm4, %v762_v47, 0 }
 0x523   : > { %v645_v48 = vpack.c.bf16 %v644_v44, %v644_v44  ;;  %v1668_v44 = vld [vmem:[#allocation9 + $0x8] sm:$0xff]  }
 0x525   : > { %v869_v43 = vpop.xlane.xlu0 %868 }
 0x526   : > { %1683 = vrcp.f32 %v869_v43 }
 0x528   : > { %v1682_v49 = vpop.eup %1681 }
 0x529   : > { %v648_v45 = vpop.permute.xlu0 %647  ;;  %v759_v51 = vmul.f32 %v1682_v49, %v1674_v31 }
 0x52a   : > { %v654_v46 = vsel %vm652_vm4, %v648_v45, 0  ;;  %v1442_v45 = vld [vmem:[#allocation2] ss:$0 sm:$0xff] }
 0x52b   : > { %1480 = vmatpush3.bf16.msra.mxu0 %v654_v46  ;;  %v760_v52 = vpack.c.bf16 %v759_v51, %v759_v51  ;;  %v1434_v46 = vld [vmem:[%s2422_s29] ss:$0 sm:$0xff] }
 0x52c   : > { %1491 = vmatprep.subr.bf16.mxu0 %v1923_v26 }
 0x52d   : > { %v986_v58 = vpop.permute.xlu0 %985 }
 0x52e   : > { %1482 = vmatmul.mubr.msk.bf16.vlgmr.msra.gmra.mrb[4].mxu0 %vm585_vm2, %v645_v48  ;;  %v991_v60 = vsel %vm652_vm4, %v986_v58, 0 }
 0x52f   : > { %1492 = vmatpush3.bf16.msra.mxu0 %v767_v50  ;;  %1493 = vmatprep.mubr.msk.bf16.mxu0 %vm1924_vm1, %v1923_v26 }
 0x530   : > { %1503 = vmatprep.subr.bf16.mxu0 %v1923_v26  ;;  %v1684_v53 = vpop.eup %1683 }
 0x531   : > { %v871_v55 = vmul.f32 %v1684_v53, %v1676_v33 }
 0x533   : > { %v872_v59 = vpack.c.bf16 %v871_v55, %v871_v55 }
 0x536   : > { %1494 = vmatmul.mubr.msk.bf16.vlgmr.msra.gmra.mrb[8].mxu0 %vm585_vm2, %v760_v52 }
 0x537   : > { %1505 = vmatprep.mubr.msk.bf16.mxu0 %vm1924_vm1, %v1923_v26 }
 0x552   : > { %v981_v54 = vpop.xlane.xlu1 %980 }
 0x553   : > { %1685 = vrcp.f32 %v981_v54 }
 0x556   : > { %v874_v56 = vpop.permute.xlu1 %873 }
 0x557   : > { %v879_v57 = vsel %vm652_vm4, %v874_v56, 0 }
 0x558   : > { %1504 = vmatpush3.bf16.msra.mxu0 %v879_v57 }
 0x559   : > { %1515 = vmatprep.subr.bf16.mxu0 %v1923_v26 }
 0x55b   : > { %1506 = vmatmul.mubr.msk.bf16.vlgmr.msra.gmra.mrb[12].mxu0 %vm585_vm2, %v872_v59 }
 0x55c   : > { %1516 = vmatpush3.bf16.msra.mxu0 %v991_v60  ;;  %1517 = vmatprep.mubr.msk.bf16.mxu0 %vm1924_vm1, %v1923_v26 }
 0x55d   : > { %v1686_v61 = vpop.eup %1685  ;;  %1529 = vmatprep.subr.bf16.mxu0 %v1923_v26 }
 0x55e   : > { %v983_v62 = vmul.f32 %v1686_v61, %v1678_v39 }
 0x560   : > { %v984_v63 = vpack.c.bf16 %v983_v62, %v983_v62 }
 0x563   : > { %1518 = vmatmul.mubr.msk.bf16.vlgmr.msra.gmra.mrb[16].mxu0 %vm585_vm2, %v984_v63 }
 0x564   : > { %1533 = vmatprep.mubr.msk.bf16.mxu0 %vm1924_vm1, %v1923_v26  ;;  %1530 = vmatpush3.bf16.msra.mxu0 %v1665_v36 }
 0x565   : > { %1531 = vmatprep.subr.bf16.mxu0 %v1923_v26 }
 0x568   : > { %1532 = vmatpush3.bf16.msra.mxu0 %v1666_v37 }
 0x601   : > { %v690_v0 = vpop.f32.mrb[4].mxu0 }
 0x602   : > { %v1483_v1 = vpop.f32.mrb[5].mxu0 }
 0x603   : > { %v693_v2 = vpop.f32.mrb[6].mxu0 }
 0x604   : > { %v1484_v3 = vpop.f32.mrb[7].mxu0 }
 0x609   : > { %v803_v4 = vpop.f32.mrb[8].mxu0 }
 0x60a   : > { %1034 = vrot.lane.b32.xlu1 %v803_v4, %s1936_s28  ;;  %v1495_v5 = vpop.f32.mrb[9].mxu0  ;;  %s459_s28 = scalar_lea.vmem [#allocation12], %s1411_s30  ;;  %s1839_s30 = sshll.u32 %s1939_s24, 4  ;;  %s1840_s30 = int_to_ptr.vmem [resolvable:$false] %s1839_s30 }
 0x60b   : > { %v806_v6 = vpop.f32.mrb[10].mxu0  ;;  %s1841_s5 = scalar_lea.vmem %s1840_s30, 256 }
 0x60c   : > { %v1496_v7 = vpop.f32.mrb[11].mxu0 }
 0x62e   : > { %v915_v10 = vpop.f32.mrb[12].mxu0 }
 0x62f   : > { %1038 = vrot.lane.b32.xlu0 %v915_v10, %s1937_s27  ;;  %v1507_v11 = vpop.f32.mrb[13].mxu0  ;;  %s1293_s27 = sshll.u32 %s459_s28, 4  ;;  %s2345_s27 = int_to_ptr.vmem [resolvable:$true] %s1293_s27 }
 0x630   : > { %v918_v12 = vpop.f32.mrb[14].mxu0  ;;  %s1835_s13 = scalar_lea.vmem %s2345_s27, 128  ;;  %p1842_p10 = scmp.lt.s32.totalorder %s2345_s27, %s1840_s30 }
 0x631   : > { %v1508_v13 = vpop.f32.mrb[15].mxu0  ;;  %p1836_p6 = scmp.ne.s32.totalorder %s2345_s27, %s1835_s13  ;;  %p1843_p11 = scmp.lt.s32.totalorder %s1841_s5, %s1835_s13 }
 0x633   : > { %p1837_p2 = pnand %p1836_p6, %p2424_p0  ;;  %p1844_p3 = por %p1843_p11, %p1842_p10 }
 0x635   : > { %p1838_p5 = pneg %p1837_p2 }
 0x636   : > { %v1027_v14 = vpop.f32.mrb[16].mxu0 }
 0x637   : > { %1042 = vrot.lane.b32.xlu1 %v1027_v14, %s1938_s23  ;;  %v1519_v16 = vpop.f32.mrb[17].mxu0  ;;  %p1845_p12 = pnand %p1844_p3, %p1838_p5 }
 0x638   : > { %v1030_v18 = vpop.f32.mrb[18].mxu0 }
 0x639   : > { %v1520_v20 = vpop.f32.mrb[19].mxu0 }
 0x63b   : > { %1261 = vperm.xlu1 %1655, %v1442_v45  }
 0x67c   : > { %v1035_v21 = vpop.permute.xlu1 %1034 }
 0x67d   : > { %v1045_v23 = vsel %vm585_vm2, %v690_v0, %v1035_v21 }
 0x6a1   : > { %v1039_v22 = vpop.permute.xlu0 %1038 }
 0x6a2   : > { %v1047_v24 = vsel %vm1046_vm5, %v1045_v23, %v1039_v22 }
 0x6a9   : > { %v1043_v25 = vpop.permute.xlu1 %1042 }
 0x6aa   : > { %v1049_v27 = vsel %vm1048_vm6, %v1047_v24, %v1043_v25 }
 0x6ab   : > { %v1050_v28 = vpack.c.bf16 %v1049_v27, %v1049_v27 }
 0x6ad   : > { %1526 = vmatmul.mubr.msk.bf16.vlgmr.msra.gmra.mrb[16].mxu1 %vm464_vm0, %v1050_v28 }
 0x6ae   : > { %1541 = vmatprep.mubr.msk.bf16.mxu1 %vm1924_vm1, %v1923_v26 }
 0x6ba   : > { %v1262_v57 = vpop.permute.xlu1 %1261 }
 0x780   : > { %v1104_v29 = vpop.f32.mrb[16].mxu1 }
 0x781   : > { %v1110_v30 = vadd.f32 %v1104_v29, %v2247_v17  ;;  %v1527_v31 = vpop.f32.mrb[17].mxu1  ;;  %v1667_v17 = vld [vmem:[#allocation9] sm:$0xff]  }
 0x782   : > { %v1107_v32 = vpop.f32.mrb[18].mxu1  ;;  %1538 = vmatpush3.bf16.msra.mxu1 %v1667_v17 }
 0x783   : > { %v1528_v33 = vpop.f32.mrb[19].mxu1  ;;  %v1111_v34 = vmul.f32 %v1110_v30, %v1110_v30  ;;  %1539 = vmatprep.subr.bf16.mxu1 %v1923_v26 }
 0x785   : > { %v1112_v35 = vsel %vm464_vm0, %v1111_v34, 0.0 }
 0x786   : > { %1113 = vadd.xlane.f32.xlu0 %v1112_v35  ;;  %1540 = vmatpush3.bf16.msra.mxu1 %v1668_v44 }
 0x813   : > { %v1114_v38 = vpop.xlane.xlu0 %1113 }
 0x814   : > { %v1115_v39 = vmul.f32 0.03125, %v1114_v38 }
 0x816   : > { %v1116_v40 = vadd.f32 1e-08, %v1115_v39 }
 0x818   : > { %1687 = vrsqrt.f32 %v1116_v40 }
 0x822   : > { %v1688_v41 = vpop.eup %1687 }
 0x823   : > { %v1118_v42 = vmul.f32 %v1688_v41, %v1110_v30 }
 0x825   : > { %v1119_v19 = vmul.f32 %v2244_v15, %v1118_v42  ;;  %v1438_v15 = vld [vmem:[#allocation11] ss:$0 sm:$0xff] }
 0x827   : > { %v1120_v43 = vpack.c.bf16 %v1119_v19, %v1119_v19 }
 0x829   : > { %1534 = vmatmul.mubr.msk.bf16.vlgmr.msra.gmra.mrb[20].mxu0 %vm464_vm0, %v1120_v43 }
 0x8fc   : > { %v1181_v26 = vpop.f32.mrb[20].mxu0 }
 0x8fd   : > { %v1182_v47 = vadd.f32 %v1434_v46, %v1181_v26  ;;  %v1535_v48 = vpop.f32.mrb[21].mxu0 }
 0x8fe   : > { %v1184_v49 = vpop.f32.mrb[22].mxu0 }
 0x8ff   : > { %v1187_v50 = vpack.c.bf16 %v1182_v47, %v1182_v47  ;;  %v1536_v51 = vpop.f32.mrb[23].mxu0 }
 0x901   : > { %1542 = vmatmul.mubr.msk.bf16.vlgmr.msra.gmra.mrb[20].mxu1 %vm464_vm0, %v1187_v50 }
 0x9d4   : > { %v1248_v52 = vpop.f32.mrb[20].mxu1 }
 0x9d5   : > { %v1249_v53 = vadd.f32 %v1438_v15, %v1248_v52  ;;  %v1543_v54 = vpop.f32.mrb[21].mxu1 }
 0x9d6   : > { %v1251_v55 = vpop.f32.mrb[22].mxu1 }
 0x9d7   : > { %1273 = vrot.lane.b32.xlu1 %v1249_v53, %s1922_s12  ;;  %v1544_v56 = vpop.f32.mrb[23].mxu1  ;;  %v1264_v58 = vmul.f32 %v1262_v57, %v1249_v53 }
 0x9d9   : > { %v1443_v59 = vmul.f32 -1.442695, %v1264_v58 }
 0x9db   : > { %1689 = vpow2.f32 %v1443_v59 }
 0x9e5   : > { %v1690_v60 = vpop.eup %1689 }
 0x9e6   : > { %v1268_v61 = vadd.f32 1.0, %v1690_v60 }
 0x9e8   : > { %1691 = vrcp.f32 %v1268_v61 }
 0x9f2   : > { %v1692_v62 = vpop.eup %1691 }
 0x9f3   : > { %v1271_v63 = vmul.f32 %v1692_v62, %v1249_v53 }
 0xa49   : > { %v1274_v0 = vpop.permute.xlu1 %1273 }
 0xa4a   : > { %v1276_v1 = vmul.f32 %v1274_v0, %v1271_v63 }
 0xa4c   : > { %v1277_v2 = vadd.f32 %v1276_v1, %v1119_v19 }
 0xa4e   : > { %1278 = vst.msk [vmem:[%s459_s28] sm:$0xff] %vm464_vm0, %v1277_v2 }
 0xa4f   : > { %1848 = shalt.err (!%p1845_p12)
}
 0xa50   : > { %s1849_s2 = scalar_lea.hbm %s2343_s11, 128  ;;  %s1853_s16 = scalar_lea.hbm %s2423_s15, 256 }
 0xa51   : > { %p1850_p13 = scmp.ne.s32.totalorder %s2343_s11, %s1849_s2  ;;  %p1854_p9 = scmp.lt.u32.totalorder %s2343_s11, %s2423_s15 }
 0xa52   : > { %p1855_p4 = scmp.lt.u32.totalorder %s1853_s16, %s1849_s2  ;;  %p1857_p6 = scmp.lt.u32.totalorder %s1849_s2, %s2343_s11 }
 0xa53   : > { %p1851_p1 = pnand %p1850_p13, %p2424_p0 }
 0xa54   : > { %p1856_p8 = por %p1855_p4, %p1854_p9 }
 0xa55   : > { %p1852_p7 = pneg %p1851_p1 }
 0xa56   : > { %p1858_p2 = por %p1857_p6, %p1856_p8 }
 0xa58   : > { %p1859_p5 = pnand %p1858_p2, %p1852_p7 }
 0xa5a   : > { %1862 = shalt.err (!%p1859_p5)
}
 0xa5b   : > { %1563 = dma.vmem_to_hbm [thread:$0]  (%p2424_p0), %s2345_s27, 128, %s2343_s11, %s1280_s25  }
 0xa5c PF: > { %s1305_s23 = sand.u32 1, %s1897_s19   ;;  %p2425_p10 = scmp.ne.s32.totalorder %s2415_s8, 0 }
 0xa5d   : > { %p2426_p11 = scmp.ge.s32.totalorder %s1909_s22, 2  ;;  %s1306_s13 = scalar_lea.sflag [#allocation5], %s1305_s23 }
 0xa5f   : > { %p1583_p3 = pnand %p2426_p11, %p2425_p10 }
 0xa61   : > { %1892 = dma.done.wait (!%p1583_p3), %s1306_s13, 128  }
 0xa62   : > { %1894 = vsyncadd (!%p1583_p3), %s1306_s13, 4294967168  ;;  %p28_p12 = scmp.ge.s32.totalorder %s2139_s26, 4   ;;  %s2427_s19 = smov %s1901_s20 }
 0xa63   : > { %s2428_s20 = smov %s1905_s21  ;;  %s2429_s21 = smov %s2150_s14 }
 0xa64   : > { %s2430_s22 = smov %s2139_s26  ;;  %30 = sbr.rel (!%p28_p12) target bundleno = 11 (0xb), region = 125 }
 0xa6b   :  { %1311 = vsyncpa [#allocation4], 1 }
 0xa6c   :  { %1313 = vsyncpa [#allocation4 + $0x1], 1 }
 0xa6d   :  { %1314 = vsyncpa [#allocation7], 1 }
 0xa6e   :  { %1315 = vsyncpa [#allocation10], 1 }
 0xa6f   :  { %1316 = vsyncpa [#allocation5], 1 }
 0xa70   :  { %1318 = vsyncpa [#allocation5 + $0x1], 1 }

</bundles_post_ra>
